<compile_context>
chip_gen: v5e
topology: v5e:2x2
jax: 0.10.0
libtpu: 0.0.40
codegen_flags: <defaults>
</compile_context>

<pallas_src>
import functools

import numpy as np
import jax
import jax.numpy as jnp
from jax import lax
from jax.experimental import pallas as pl
from jax.experimental.pallas import tpu as pltpu


def _inception_kernel(x_ref, m_ref, w1_ref, sh1_ref, wd_ref, sh2_ref, w2_ref,
                      b2_ref, o_ref, *, H, W):
    """One batch element per grid step. Activations laid out as (C, H*W)."""
    HW = H * W
    Ch = w1_ref.shape[0]

    # ---- 1x1 conv (BN folded into weights) + shift + ReLU --------------------
    # bf16 operands on the MXU, f32 accumulation.
    h = jnp.dot(w1_ref[...], x_ref[...],
                preferred_element_type=jnp.float32)            # (Ch, HW) f32
    h = jnp.maximum(h + sh1_ref[...], 0.0)

    # ---- depthwise 3x3 conv, padding=1 ---------------------------------------
    # XLU rolls along the flattened H*W lane axis + precomputed boundary masks
    # (destination-indexed), all VPU math in f32.
    acc = jnp.zeros((Ch, HW), dtype=jnp.float32)
    k = 0
    mi = 0
    for dy in (-1, 0, 1):
        for dx in (-1, 0, 1):
            tap = wd_ref[:, k:k + 1]                           # (Ch, 1), BN-scaled
            d = dy * W + dx
            if d == 0:
                acc = acc + h * tap                            # center: no mask
            else:
                # src[p] = h[(p + d) mod HW]; cross-boundary wraps are masked.
                src = pltpu.roll(h, shift=(-d) % HW, axis=1)
                acc = acc + (src * m_ref[mi:mi + 1, :]) * tap
                mi += 1
            k += 1

    g = jnp.maximum(acc + sh2_ref[...], 0.0)                   # folded BN shift + ReLU

    # ---- final 1x1 conv -------------------------------------------------------
    out = jnp.dot(w2_ref[...], g.astype(jnp.bfloat16),
                  preferred_element_type=jnp.float32)          # (Cout, HW) f32
    o_ref[...] = (out + b2_ref[...]).astype(o_ref.dtype)


def _boundary_masks(H, W):
    """(8, H*W) f32 masks (one per non-center tap), destination-indexed:
    mask[p] = 1 iff source pixel (y+dy, x+dx) is in bounds."""
    ys, xs = np.meshgrid(np.arange(H), np.arange(W), indexing="ij")
    ys = ys.reshape(-1)
    xs = xs.reshape(-1)
    rows = []
    for dy in (-1, 0, 1):
        for dx in (-1, 0, 1):
            if dy == 0 and dx == 0:
                continue
            ok = (ys + dy >= 0) & (ys + dy < H) & (xs + dx >= 0) & (xs + dx < W)
            rows.append(ok.astype(np.float32))
    return jnp.asarray(np.stack(rows, axis=0))


def inception_forward(x_nchw, params):
    """Runs the fused Inception block. Input/output in NCHW (PyTorch convention)."""
    (w1t, sh1, wd_taps, sh2, w2t, b2) = params
    N, Cin, H, W = x_nchw.shape
    HW = H * W
    Ch = w1t.shape[0]
    Cout = w2t.shape[0]

    # Row-major reshape: NCHW -> (N, C, H*W). No transpose. bf16 activation I/O
    # halves the dominant HBM transfer.
    x_flat = x_nchw.reshape(N, Cin, HW).astype(jnp.bfloat16)
    masks = _boundary_masks(H, W)                               # (8, HW) f32

    grid_spec = pltpu.PrefetchScalarGridSpec(
        num_scalar_prefetch=0,
        grid=(N,),
        in_specs=[
            pl.BlockSpec((pl.Squeezed(), Cin, HW), lambda n: (n, 0, 0)),  # x (bf16)
            pl.BlockSpec((8, HW), lambda n: (0, 0)),                       # boundary masks
            pl.BlockSpec((Ch, Cin), lambda n: (0, 0)),                     # w1 (BN-folded, bf16)
            pl.BlockSpec((Ch, 1), lambda n: (0, 0)),                       # shift1
            pl.BlockSpec((Ch, 16), lambda n: (0, 0)),                      # depthwise taps (lane-packed)
            pl.BlockSpec((Ch, 1), lambda n: (0, 0)),                       # shift2
            pl.BlockSpec((Cout, Ch), lambda n: (0, 0)),                    # w2 (bf16)
            pl.BlockSpec((Cout, 1), lambda n: (0, 0)),                     # b2
        ],
        out_specs=pl.BlockSpec((pl.Squeezed(), Cout, HW), lambda n: (n, 0, 0)),
    )

    flops = 2 * N * HW * (Cin * Ch + 9 * Ch + Ch * Cout)
    static_bytes = int(masks.size) * 4 + sum(
        int(p.size) * p.dtype.itemsize for p in params)
    bytes_accessed = (N * Cin * HW) * 2 + (N * Cout * HW) * 4 + static_bytes

    out_flat = pl.pallas_call(
        functools.partial(_inception_kernel, H=H, W=W),
        out_shape=jax.ShapeDtypeStruct((N, Cout, HW), jnp.float32),
        grid_spec=grid_spec,
        compiler_params=pltpu.CompilerParams(dimension_semantics=("parallel",)),
        cost_estimate=pl.CostEstimate(flops=flops, transcendentals=0,
                                      bytes_accessed=bytes_accessed),
    )(x_flat, masks, w1t, sh1, wd_taps, sh2, w2t, b2)

    return out_flat.reshape(N, Cout, H, W)          # already NCHW


def make_params(key, in_ch, out_ch):
    """Deterministic parameter init mimicking the PyTorch module's shapes,
    plus BN/bias folding into kernel-friendly layouts."""
    hide_ch = out_ch // 2
    eps = 1e-5
    keys = jax.random.split(key, 12)

    # Conv2d(in_ch, hide_ch, 1)
    w1_oihw = jax.random.normal(keys[0], (hide_ch, in_ch, 1, 1), jnp.float32) * 0.2
    b1 = jax.random.normal(keys[1], (hide_ch,), jnp.float32) * 0.1
    # BatchNorm2d(hide_ch)
    g1 = 1.0 + 0.1 * jax.random.normal(keys[2], (hide_ch,), jnp.float32)
    be1 = 0.1 * jax.random.normal(keys[3], (hide_ch,), jnp.float32)
    m1 = 0.1 * jax.random.normal(keys[4], (hide_ch,), jnp.float32)
    v1 = 1.0 + 0.5 * jax.random.uniform(keys[5], (hide_ch,), jnp.float32)
    # Conv2d(hide, hide, 3, padding=1, groups=hide)
    wd_oihw = jax.random.normal(keys[6], (hide_ch, 1, 3, 3), jnp.float32) * 0.2
    bd = jax.random.normal(keys[7], (hide_ch,), jnp.float32) * 0.1
    # BatchNorm2d(hide_ch)
    g2 = 1.0 + 0.1 * jax.random.normal(keys[8], (hide_ch,), jnp.float32)
    be2 = 0.1 * jax.random.normal(keys[9], (hide_ch,), jnp.float32)
    m2 = 0.1 * jax.random.normal(keys[10], (hide_ch,), jnp.float32)
    v2 = 1.0 + 0.5 * jax.random.uniform(keys[11], (hide_ch,), jnp.float32)
    # Conv2d(hide, out, 1)
    k2a, k2b = jax.random.split(keys[0])
    w2_oihw = jax.random.normal(k2a, (out_ch, hide_ch, 1, 1), jnp.float32) * 0.2
    b2 = jax.random.normal(k2b, (out_ch,), jnp.float32) * 0.1

    # Fold BN (eval mode) + conv bias: y = relu(conv(x)*s + shift).
    s1 = g1 / jnp.sqrt(v1 + eps)
    sh1 = (b1 - m1) * s1 + be1
    s2 = g2 / jnp.sqrt(v2 + eps)
    sh2 = (bd - m2) * s2 + be2

    # 1x1 conv weights with BN scale folded; bf16 for the MXU.
    w1t = (w1_oihw[:, :, 0, 0] * s1[:, None]).astype(jnp.bfloat16)   # (hide, in)
    w2t = w2_oihw[:, :, 0, 0].astype(jnp.bfloat16)                   # (out, hide)

    # Depthwise taps: lane-packed (hide, 16) f32 tile (9 taps + pad), BN folded.
    taps = jnp.stack([wd_oihw[:, 0, dy + 1, dx + 1] * s2
                      for dy in (-1, 0, 1) for dx in (-1, 0, 1)], axis=1)  # (hide, 9)
    taps = jnp.pad(taps, ((0, 0), (0, 16 - 9)))                            # (hide, 16)

    kernel_params = (
        w1t,
        sh1[:, None].astype(jnp.float32),   # (hide, 1)
        taps.astype(jnp.float32),           # (hide, 16)
        sh2[:, None].astype(jnp.float32),   # (hide, 1)
        w2t,
        b2[:, None].astype(jnp.float32),    # (out, 1)
    )
    torch_like = dict(w1=w1_oihw, b1=b1, g1=g1, be1=be1, m1=m1, v1=v1,
                      wd=wd_oihw, bd=bd, g2=g2, be2=be2, m2=m2, v2=v2,
                      w2=w2_oihw, b2=b2, eps=eps)
    return kernel_params, torch_like


def ref_forward(x_nchw, p):
    """Pure-JAX f32 reference matching the PyTorch module (BN in eval mode)."""
    dn = ('NCHW', 'OIHW', 'NCHW')
    eps = p['eps']

    def bn(x, g, b, m, v):
        return (x - m[None, :, None, None]) / jnp.sqrt(v[None, :, None, None] + eps) \
               * g[None, :, None, None] + b[None, :, None, None]

    h = lax.conv_general_dilated(x_nchw, p['w1'], (1, 1), 'VALID',
                                 dimension_numbers=dn) + p['b1'][None, :, None, None]
    h = jax.nn.relu(bn(h, p['g1'], p['be1'], p['m1'], p['v1']))
    h = lax.conv_general_dilated(h, p['wd'], (1, 1), ((1, 1), (1, 1)),
                                 dimension_numbers=dn,
                                 feature_group_count=p['wd'].shape[0]) \
        + p['bd'][None, :, None, None]
    h = jax.nn.relu(bn(h, p['g2'], p['be2'], p['m2'], p['v2']))
    h = lax.conv_general_dilated(h, p['w2'], (1, 1), 'VALID',
                                 dimension_numbers=dn) + p['b2'][None, :, None, None]
    return h


if __name__ == "__main__":
    key = jax.random.PRNGKey(0)
    N, in_ch, out_ch, H, W = 2, 4, 8, 16, 16

    kx, kp = jax.random.split(key)
    x = jax.random.normal(kx, (N, in_ch, H, W), jnp.float32)
    kernel_params, torch_like = make_params(kp, in_ch, out_ch)

    out = jax.block_until_ready(inception_forward(x, kernel_params))
    ref = jax.block_until_ready(ref_forward(x, torch_like))

    assert out.shape == (N, out_ch, H, W), out.shape
    # bf16 activation I/O + bf16 MXU operands (f32 accumulation) -> tolerance is
    # loosened vs. the pure-f32 variant (expected ~1e-2 relative error).
    max_err = jnp.max(jnp.abs(out - ref))
    assert jnp.allclose(out, ref, atol=5e-2, rtol=5e-2), f"max abs err {max_err}"

    print("KERNEL_OK")
</pallas_src>

<mosaic_0001>
module attributes {stable_mosaic.version = 11 : i64} {
  func.func @_inception_kernel(%arg0: i32, %arg1: memref<1x4x256xbf16, #tpu.memory_space<vmem>>, %arg2: memref<8x256xf32, #tpu.memory_space<vmem>>, %arg3: memref<4x4xbf16, #tpu.memory_space<vmem>>, %arg4: memref<4x1xf32, #tpu.memory_space<vmem>>, %arg5: memref<4x16xf32, #tpu.memory_space<vmem>>, %arg6: memref<4x1xf32, #tpu.memory_space<vmem>>, %arg7: memref<8x4xbf16, #tpu.memory_space<vmem>>, %arg8: memref<8x1xf32, #tpu.memory_space<vmem>>, %arg9: memref<1x8x256xf32, #tpu.memory_space<vmem>>) attributes {dimension_semantics = [#tpu.dimension_semantics<parallel>], iteration_bounds = array<i64: 2>, scalar_prefetch = 0 : i64, scratch_operands = 0 : i64, tpu.core_type = #tpu.core_type<tc>, window_params = [{transform_indices = @transform_0, window_bounds = array<i64: 1, 4, 256>}, {pipeline_mode = #tpu.pipeline_mode<synchronous>, transform_indices = @transform_1, window_bounds = array<i64: 8, 256>}, {pipeline_mode = #tpu.pipeline_mode<synchronous>, transform_indices = @transform_2, window_bounds = array<i64: 4, 4>}, {pipeline_mode = #tpu.pipeline_mode<synchronous>, transform_indices = @transform_3, window_bounds = array<i64: 4, 1>}, {pipeline_mode = #tpu.pipeline_mode<synchronous>, transform_indices = @transform_4, window_bounds = array<i64: 4, 16>}, {pipeline_mode = #tpu.pipeline_mode<synchronous>, transform_indices = @transform_5, window_bounds = array<i64: 4, 1>}, {pipeline_mode = #tpu.pipeline_mode<synchronous>, transform_indices = @transform_6, window_bounds = array<i64: 8, 4>}, {pipeline_mode = #tpu.pipeline_mode<synchronous>, transform_indices = @transform_7, window_bounds = array<i64: 8, 1>}, {transform_indices = @transform_8, window_bounds = array<i64: 1, 8, 256>}]} {
    %c0 = arith.constant 0 : index
    %c0_0 = arith.constant 0 : index
    %0 = vector.load %arg3[%c0, %c0_0] : memref<4x4xbf16, #tpu.memory_space<vmem>>, vector<4x4xbf16>
    %c0_1 = arith.constant 0 : index
    %c0_2 = arith.constant 0 : index
    %c0_3 = arith.constant 0 : index
    %1 = vector.load %arg1[%c0_1, %c0_2, %c0_3] : memref<1x4x256xbf16, #tpu.memory_space<vmem>>, vector<1x4x256xbf16>
    %2 = vector.shape_cast %1 : vector<1x4x256xbf16> to vector<4x256xbf16>
    %cst = arith.constant dense<0.000000e+00> : vector<4x256xf32>
    %3 = tpu.matmul %0, %2, %cst {dimension_numbers = #tpu.dot_dimension_numbers<[1], [0], [0], [1], [0, 0, 1, 1], [], []>} : vector<4x4xbf16>, vector<4x256xbf16>, vector<4x256xf32> -> vector<4x256xf32>
    %c0_4 = arith.constant 0 : index
    %c0_5 = arith.constant 0 : index
    %4 = vector.load %arg4[%c0_4, %c0_5] : memref<4x1xf32, #tpu.memory_space<vmem>>, vector<4x1xf32>
    %5 = vector.broadcast %4 : vector<4x1xf32> to vector<4x256xf32>
    %6 = arith.addf %3, %5 : vector<4x256xf32>
    %cst_6 = arith.constant 0.000000e+00 : f32
    %7 = vector.broadcast %cst_6 : f32 to vector<4x256xf32>
    %8 = arith.maximumf %6, %7 : vector<4x256xf32>
    %cst_7 = arith.constant 0.000000e+00 : f32
    %9 = vector.broadcast %cst_7 : f32 to vector<4x256xf32>
    %c0_8 = arith.constant 0 : index
    %c0_9 = arith.constant 0 : index
    %10 = vector.load %arg5[%c0_8, %c0_9] : memref<4x16xf32, #tpu.memory_space<vmem>>, vector<4x1xf32>
    %c17_i32 = arith.constant 17 : i32
    %11 = tpu.dynamic_rotate %8 by %c17_i32 dim 1 : vector<4x256xf32>, i32 -> vector<4x256xf32>
    %c0_10 = arith.constant 0 : index
    %c0_11 = arith.constant 0 : index
    %12 = vector.load %arg2[%c0_10, %c0_11] : memref<8x256xf32, #tpu.memory_space<vmem>>, vector<1x256xf32>
    %13 = vector.broadcast %12 : vector<1x256xf32> to vector<4x256xf32>
    %14 = arith.mulf %11, %13 : vector<4x256xf32>
    %15 = vector.broadcast %10 : vector<4x1xf32> to vector<4x256xf32>
    %16 = arith.mulf %14, %15 : vector<4x256xf32>
    %17 = arith.addf %9, %16 : vector<4x256xf32>
    %c0_12 = arith.constant 0 : index
    %c1 = arith.constant 1 : index
    %18 = vector.load %arg5[%c0_12, %c1] : memref<4x16xf32, #tpu.memory_space<vmem>>, vector<4x1xf32>
    %c16_i32 = arith.constant 16 : i32
    %19 = tpu.dynamic_rotate %8 by %c16_i32 dim 1 : vector<4x256xf32>, i32 -> vector<4x256xf32>
    %c1_13 = arith.constant 1 : index
    %c0_14 = arith.constant 0 : index
    %20 = vector.load %arg2[%c1_13, %c0_14] : memref<8x256xf32, #tpu.memory_space<vmem>>, vector<1x256xf32>
    %21 = vector.broadcast %20 : vector<1x256xf32> to vector<4x256xf32>
    %22 = arith.mulf %19, %21 : vector<4x256xf32>
    %23 = vector.broadcast %18 : vector<4x1xf32> to vector<4x256xf32>
    %24 = arith.mulf %22, %23 : vector<4x256xf32>
    %25 = arith.addf %17, %24 : vector<4x256xf32>
    %c0_15 = arith.constant 0 : index
    %c2 = arith.constant 2 : index
    %26 = vector.load %arg5[%c0_15, %c2] : memref<4x16xf32, #tpu.memory_space<vmem>>, vector<4x1xf32>
    %c15_i32 = arith.constant 15 : i32
    %27 = tpu.dynamic_rotate %8 by %c15_i32 dim 1 : vector<4x256xf32>, i32 -> vector<4x256xf32>
    %c2_16 = arith.constant 2 : index
    %c0_17 = arith.constant 0 : index
    %28 = vector.load %arg2[%c2_16, %c0_17] : memref<8x256xf32, #tpu.memory_space<vmem>>, vector<1x256xf32>
    %29 = vector.broadcast %28 : vector<1x256xf32> to vector<4x256xf32>
    %30 = arith.mulf %27, %29 : vector<4x256xf32>
    %31 = vector.broadcast %26 : vector<4x1xf32> to vector<4x256xf32>
    %32 = arith.mulf %30, %31 : vector<4x256xf32>
    %33 = arith.addf %25, %32 : vector<4x256xf32>
    %c0_18 = arith.constant 0 : index
    %c3 = arith.constant 3 : index
    %34 = vector.load %arg5[%c0_18, %c3] : memref<4x16xf32, #tpu.memory_space<vmem>>, vector<4x1xf32>
    %c1_i32 = arith.constant 1 : i32
    %35 = tpu.dynamic_rotate %8 by %c1_i32 dim 1 : vector<4x256xf32>, i32 -> vector<4x256xf32>
    %c3_19 = arith.constant 3 : index
    %c0_20 = arith.constant 0 : index
    %36 = vector.load %arg2[%c3_19, %c0_20] : memref<8x256xf32, #tpu.memory_space<vmem>>, vector<1x256xf32>
    %37 = vector.broadcast %36 : vector<1x256xf32> to vector<4x256xf32>
    %38 = arith.mulf %35, %37 : vector<4x256xf32>
    %39 = vector.broadcast %34 : vector<4x1xf32> to vector<4x256xf32>
    %40 = arith.mulf %38, %39 : vector<4x256xf32>
    %41 = arith.addf %33, %40 : vector<4x256xf32>
    %c0_21 = arith.constant 0 : index
    %c4 = arith.constant 4 : index
    %42 = vector.load %arg5[%c0_21, %c4] : memref<4x16xf32, #tpu.memory_space<vmem>>, vector<4x1xf32>
    %43 = vector.broadcast %42 : vector<4x1xf32> to vector<4x256xf32>
    %44 = arith.mulf %8, %43 : vector<4x256xf32>
    %45 = arith.addf %41, %44 : vector<4x256xf32>
    %c0_22 = arith.constant 0 : index
    %c5 = arith.constant 5 : index
    %46 = vector.load %arg5[%c0_22, %c5] : memref<4x16xf32, #tpu.memory_space<vmem>>, vector<4x1xf32>
    %c255_i32 = arith.constant 255 : i32
    %47 = tpu.dynamic_rotate %8 by %c255_i32 dim 1 : vector<4x256xf32>, i32 -> vector<4x256xf32>
    %c4_23 = arith.constant 4 : index
    %c0_24 = arith.constant 0 : index
    %48 = vector.load %arg2[%c4_23, %c0_24] : memref<8x256xf32, #tpu.memory_space<vmem>>, vector<1x256xf32>
    %49 = vector.broadcast %48 : vector<1x256xf32> to vector<4x256xf32>
    %50 = arith.mulf %47, %49 : vector<4x256xf32>
    %51 = vector.broadcast %46 : vector<4x1xf32> to vector<4x256xf32>
    %52 = arith.mulf %50, %51 : vector<4x256xf32>
    %53 = arith.addf %45, %52 : vector<4x256xf32>
    %c0_25 = arith.constant 0 : index
    %c6 = arith.constant 6 : index
    %54 = vector.load %arg5[%c0_25, %c6] : memref<4x16xf32, #tpu.memory_space<vmem>>, vector<4x1xf32>
    %c241_i32 = arith.constant 241 : i32
    %55 = tpu.dynamic_rotate %8 by %c241_i32 dim 1 : vector<4x256xf32>, i32 -> vector<4x256xf32>
    %c5_26 = arith.constant 5 : index
    %c0_27 = arith.constant 0 : index
    %56 = vector.load %arg2[%c5_26, %c0_27] : memref<8x256xf32, #tpu.memory_space<vmem>>, vector<1x256xf32>
    %57 = vector.broadcast %56 : vector<1x256xf32> to vector<4x256xf32>
    %58 = arith.mulf %55, %57 : vector<4x256xf32>
    %59 = vector.broadcast %54 : vector<4x1xf32> to vector<4x256xf32>
    %60 = arith.mulf %58, %59 : vector<4x256xf32>
    %61 = arith.addf %53, %60 : vector<4x256xf32>
    %c0_28 = arith.constant 0 : index
    %c7 = arith.constant 7 : index
    %62 = vector.load %arg5[%c0_28, %c7] : memref<4x16xf32, #tpu.memory_space<vmem>>, vector<4x1xf32>
    %c240_i32 = arith.constant 240 : i32
    %63 = tpu.dynamic_rotate %8 by %c240_i32 dim 1 : vector<4x256xf32>, i32 -> vector<4x256xf32>
    %c6_29 = arith.constant 6 : index
    %c0_30 = arith.constant 0 : index
    %64 = vector.load %arg2[%c6_29, %c0_30] : memref<8x256xf32, #tpu.memory_space<vmem>>, vector<1x256xf32>
    %65 = vector.broadcast %64 : vector<1x256xf32> to vector<4x256xf32>
    %66 = arith.mulf %63, %65 : vector<4x256xf32>
    %67 = vector.broadcast %62 : vector<4x1xf32> to vector<4x256xf32>
    %68 = arith.mulf %66, %67 : vector<4x256xf32>
    %69 = arith.addf %61, %68 : vector<4x256xf32>
    %c0_31 = arith.constant 0 : index
    %c8 = arith.constant 8 : index
    %70 = vector.load %arg5[%c0_31, %c8] : memref<4x16xf32, #tpu.memory_space<vmem>>, vector<4x1xf32>
    %c239_i32 = arith.constant 239 : i32
    %71 = tpu.dynamic_rotate %8 by %c239_i32 dim 1 : vector<4x256xf32>, i32 -> vector<4x256xf32>
    %c7_32 = arith.constant 7 : index
    %c0_33 = arith.constant 0 : index
    %72 = vector.load %arg2[%c7_32, %c0_33] : memref<8x256xf32, #tpu.memory_space<vmem>>, vector<1x256xf32>
    %73 = vector.broadcast %72 : vector<1x256xf32> to vector<4x256xf32>
    %74 = arith.mulf %71, %73 : vector<4x256xf32>
    %75 = vector.broadcast %70 : vector<4x1xf32> to vector<4x256xf32>
    %76 = arith.mulf %74, %75 : vector<4x256xf32>
    %77 = arith.addf %69, %76 : vector<4x256xf32>
    %c0_34 = arith.constant 0 : index
    %c0_35 = arith.constant 0 : index
    %78 = vector.load %arg6[%c0_34, %c0_35] : memref<4x1xf32, #tpu.memory_space<vmem>>, vector<4x1xf32>
    %79 = vector.broadcast %78 : vector<4x1xf32> to vector<4x256xf32>
    %80 = arith.addf %77, %79 : vector<4x256xf32>
    %cst_36 = arith.constant 0.000000e+00 : f32
    %81 = vector.broadcast %cst_36 : f32 to vector<4x256xf32>
    %82 = arith.maximumf %80, %81 : vector<4x256xf32>
    %c0_37 = arith.constant 0 : index
    %c0_38 = arith.constant 0 : index
    %83 = vector.load %arg7[%c0_37, %c0_38] : memref<8x4xbf16, #tpu.memory_space<vmem>>, vector<8x4xbf16>
    %84 = arith.truncf %82 : vector<4x256xf32> to vector<4x256xbf16>
    %cst_39 = arith.constant dense<0.000000e+00> : vector<8x256xf32>
    %85 = tpu.matmul %83, %84, %cst_39 {dimension_numbers = #tpu.dot_dimension_numbers<[1], [0], [0], [1], [0, 0, 1, 1], [], []>} : vector<8x4xbf16>, vector<4x256xbf16>, vector<8x256xf32> -> vector<8x256xf32>
    %c0_40 = arith.constant 0 : index
    %c0_41 = arith.constant 0 : index
    %86 = vector.load %arg8[%c0_40, %c0_41] : memref<8x1xf32, #tpu.memory_space<vmem>>, vector<8x1xf32>
    %87 = vector.broadcast %86 : vector<8x1xf32> to vector<8x256xf32>
    %88 = arith.addf %85, %87 : vector<8x256xf32>
    %c0_42 = arith.constant 0 : index
    %c0_43 = arith.constant 0 : index
    %c0_44 = arith.constant 0 : index
    %89 = vector.load %arg9[%c0_42, %c0_43, %c0_44] : memref<1x8x256xf32, #tpu.memory_space<vmem>>, vector<1x8x256xf32>
    %90 = vector.shape_cast %89 : vector<1x8x256xf32> to vector<8x256xf32>
    %91 = vector.shape_cast %88 : vector<8x256xf32> to vector<1x8x256xf32>
    tpu.vector_store %arg9[%c0_42, %c0_43, %c0_44], %91 {strides = array<i32>} : memref<1x8x256xf32, #tpu.memory_space<vmem>>, vector<1x8x256xf32>,
    return
  }
  func.func @transform_0(%arg0: i32) -> (i32, i32, i32) {
    %c0_i32 = arith.constant 0 : i32
    %c0_i32_0 = arith.constant 0 : i32
    %c0_i32_1 = arith.constant 0 : i32
    return %arg0, %c0_i32, %c0_i32_0 : i32, i32, i32
  }
  func.func @transform_1(%arg0: i32) -> (i32, i32) {
    %c0_i32 = arith.constant 0 : i32
    %c0_i32_0 = arith.constant 0 : i32
    %c0_i32_1 = arith.constant 0 : i32
    return %c0_i32, %c0_i32_0 : i32, i32
  }
  func.func @transform_2(%arg0: i32) -> (i32, i32) {
    %c0_i32 = arith.constant 0 : i32
    %c0_i32_0 = arith.constant 0 : i32
    %c0_i32_1 = arith.constant 0 : i32
    return %c0_i32, %c0_i32_0 : i32, i32
  }
  func.func @transform_3(%arg0: i32) -> (i32, i32) {
    %c0_i32 = arith.constant 0 : i32
    %c0_i32_0 = arith.constant 0 : i32
    %c0_i32_1 = arith.constant 0 : i32
    return %c0_i32, %c0_i32_0 : i32, i32
  }
  func.func @transform_4(%arg0: i32) -> (i32, i32) {
    %c0_i32 = arith.constant 0 : i32
    %c0_i32_0 = arith.constant 0 : i32
    %c0_i32_1 = arith.constant 0 : i32
    return %c0_i32, %c0_i32_0 : i32, i32
  }
  func.func @transform_5(%arg0: i32) -> (i32, i32) {
    %c0_i32 = arith.constant 0 : i32
    %c0_i32_0 = arith.constant 0 : i32
    %c0_i32_1 = arith.constant 0 : i32
    return %c0_i32, %c0_i32_0 : i32, i32
  }
  func.func @transform_6(%arg0: i32) -> (i32, i32) {
    %c0_i32 = arith.constant 0 : i32
    %c0_i32_0 = arith.constant 0 : i32
    %c0_i32_1 = arith.constant 0 : i32
    return %c0_i32, %c0_i32_0 : i32, i32
  }
  func.func @transform_7(%arg0: i32) -> (i32, i32) {
    %c0_i32 = arith.constant 0 : i32
    %c0_i32_0 = arith.constant 0 : i32
    %c0_i32_1 = arith.constant 0 : i32
    return %c0_i32, %c0_i32_0 : i32, i32
  }
  func.func @transform_8(%arg0: i32) -> (i32, i32, i32) {
    %c0_i32 = arith.constant 0 : i32
    %c0_i32_0 = arith.constant 0 : i32
    %c0_i32_1 = arith.constant 0 : i32
    return %arg0, %c0_i32, %c0_i32_0 : i32, i32, i32
  }
}

</mosaic_0001>

<bundles_post_ra>
// kernel: tpu_custom_call.1
= control target key start
LH: loop header
LB: loop body
LE: loop exit
PB: predicated region body
PF: predicated region fallthrough
CT: control target
= control target key end

     0   :  { %13 = vsyncpa [#allocation3], 0  ;;  %s1182_s0 = inlined_call_operand.vmem [shape: bf16[2,4,256], index: 0, kind: input, shape index: {}]   ;;  %s1183_s1 = inlined_call_operand.vmem [shape: f32[8,256], index: 1, kind: input, shape index: {}]   ;;  %s1184_s2 = inlined_call_operand.hbm [shape: bf16[4,4], index: 2, kind: input, shape index: {}]   ;;  %s1185_s3 = inlined_call_operand.vmem [shape: f32[4,1], index: 3, kind: input, shape index: {}]   ;;  %s1186_s4 = inlined_call_operand.vmem [shape: f32[4,16], index: 4, kind: input, shape index: {}]   ;;  %s1187_s5 = inlined_call_operand.vmem [shape: f32[4,1], index: 5, kind: input, shape index: {}]   ;;  %s1188_s6 = inlined_call_operand.vmem [shape: bf16[8,4], index: 6, kind: input, shape index: {}]   ;;  %s1189_s7 = inlined_call_operand.vmem [shape: f32[8,1], index: 7, kind: input, shape index: {}]   ;;  %s1190_s8 = inlined_call_operand.hbm [shape: f32[2,8,256], index: 8, kind: output, shape index: {}]  }
   0x1   :  { %14 = vsyncpa [#allocation4], 0 }
   0x2   :  { %16 = vsyncpa [#allocation4 + $0x1], 0  ;;  %s983_s27 = smov 0   ;;  %s985_s28 = smov 0  }
   0x3   :  { %s987_s29 = smov 0   ;;  %s989_s30 = smov 0  }
   0x4 LB: > { %s1004_s9 = sadd.s32 4294967295, %s918_s30   ;;  %s716_s10 = sadd.s32 4294967294, %s918_s30   ;;  %s918_s30 = sphi %s989_s30, %s1196_s30   ;;  %s914_s29 = sphi %s987_s29, %s1195_s29   ;;  %s910_s28 = sphi %s985_s28, %s1194_s28   ;;  %s906_s27 = sphi %s983_s27, %s1193_s27  }
   0x5   : > { %s1008_s11 = sadd.s32 1, %s918_s30   ;;  %s202_s12 = sadd.s32 1, %s914_s29 }
   0x6   : > { %s199_s13 = ssub.s32 %s918_s30, %s1008_s11  ;;  %p212_p0 = scmp.ne.s32.totalorder %s914_s29, %s910_s28 }
   0x7   : > { %p200_p1 = scmp.eq.s32.totalorder %s199_s13, 0  ;;  %p213_p2 = scmp.eq.s32.totalorder %s1004_s9, 1 }
   0x8   : > { %p218_p3 = scmp.ne.s32.totalorder %s910_s28, %s906_s27  ;;  %p219_p4 = scmp.eq.s32.totalorder %s716_s10, 1 }
   0x9   : > { %s1019_s14 = scalar_select %p200_p1, %s914_s29, %s202_s12  }
   0xa   : > { %p1021_p5 = por %p213_p2, %p212_p0  ;;  %p1025_p6 = por %p219_p4, %p218_p3 }
   0xb   : > { %p717_p7 = scmp.ge.s32.totalorder %s918_s30, 1  ;;  %p226_p8 = scmp.lt.s32.totalorder %s918_s30, 3 }
   0xc   : > { %p757_p9 = scmp.eq.s32.totalorder %s1004_s9, 0  ;;  %s241_s19 = sshll.u32 %s1184_s2, 4  ;;  %s242_s19 = int_to_ptr.hbm [resolvable:$true] %s241_s19 }
   0xd   : > { %p227_p10 = pnand %p717_p7, %p226_p8  ;;  %s920_s20 = smov [#allocation2]  }
   0xe   : > { %s243_s21 = sshll.u32 %s920_s20, 4  ;;  %s244_s21 = int_to_ptr.vmem [resolvable:$true] %s243_s21 }
   0xf   : > { %p749_p11 = pneg %p227_p10  ;;  %279 = sbr.rel (%p227_p10) target bundleno = 484 (0x1e4), region = 52 }
  0x11   : > { %p750_p12 = pnand %p757_p9, %p749_p11 }
  0x13   : > { %752 = dma.hbm_to_vmem [thread:$0]  (!%p750_p12), %s242_s19, 32, %s244_s21, [#allocation3]  }
  0x14   : > { %897 = dma.done.wait (%p757_p9), [#allocation3], 32  }
  0x15   : > { %899 = vsyncadd (%p757_p9), [#allocation3], 4294967264  ;;  %p314_p13 = scmp.lt.s32.totalorder %s1004_s9, 1  ;;  %v921_v0 = vmov 0   ;;  %v922_v1 = vmov 1   ;;  %vm336_vm0 = vcmask 1041408   ;;  %v374_v39 = vlaneseq }
  0x16   : > { %811 = vset.pattern.permute.xlu1 %v921_v0  ;;  %810 = vset.pattern.permute.xlu0 %v921_v0  ;;  %v1045_v3 = vld [vmem:[%s1186_s4] sm:$0xf]  ;;  %v923_v9 = vmov 4   ;;  %v924_v10 = vmov 2   ;;  %v320_v11 = vld [vmem:[#allocation2] sm:$0x3] }
  0x17   : > { %s315_s22 = scalar_select %p314_p13, %s1004_s9, 1  ;;  %812 = vset.pattern.permute.xlu2 %v922_v1  ;;  %389 = vperm.xlu1 %811, %v1045_v3   ;;  %v322_v4 = vld [vmem:[%s1185_s3] sm:$0xf]  ;;  %vm332_vm1 = vcmask 31744   ;;  %v925_v12 = vmov 5   ;;  %v926_v13 = vmov 6  }
  0x18   : > { %413 = vperm.xlu2 %812, %v1045_v3   ;;  %325 = vperm.xlu0 %810, %v322_v4   ;;  %v927_v14 = vmov 3   ;;  %s928_s18 = smov 16   ;;  %s929_s19 = smov 17   ;;  %v930_v22 = vmov 7   ;;  %v934_v25 = vmov 8   ;;  %v1094_v42 = vand.u32 127, %v374_v39 }
  0x19   : > { %s741_s23 = sshll.u32 %s315_s22, 2  ;;  %s931_s20 = smov 15   ;;  %v572_v26 = vld [vmem:[%s1187_s5] sm:$0xf] }
  0x1a   : > { %s318_s26 = scalar_lea.vmem %s1182_s0, %s741_s23  ;;  %s932_s21 = smov 127   ;;  %v727_v43 = vld [vmem:[%s1183_s1 + $0x1] ss:$8 sm:$0x3]  ;;  %vm400_vm2 = vcmp.lt.s32.totalorder %v1094_v42, 16  ;;  %vm376_vm3 = vcmp.lt.s32.totalorder %v1094_v42, 17 }
  0x1b   : > { %v321_v2 = vld [vmem:[%s318_s26] sm:$0xf]  ;;  %s933_s22 = smov 1   ;;  %s935_s23 = smov 113   ;;  %v406_v46 = vperm.slane %v727_v43, 0  ;;  %v407_v47 = vperm.slane %v727_v43, 1 }
  0x1c   : > { %329 = vst [vmem:[#allocation1] ss:$4 sm:$0xff] %v321_v2  ;;  %s936_s24 = smov 112   ;;  %s937_s25 = smov 111   ;;  %vm424_vm4 = vcmp.lt.s32.totalorder %v1094_v42, 15  ;;  %vm448_vm5 = vcmp.lt.s32.totalorder %v1094_v42, 1 }
  0x1d   : > { %v379_v44 = vld [vmem:[%s1183_s1] ss:$8 sm:$0x3]  ;;  %v728_v52 = vld [vmem:[%s1183_s1 + $0x2] ss:$8 sm:$0x3] }
  0x1e   : > { %v381_v48 = vperm.slane %v379_v44, 0  ;;  %v382_v49 = vperm.slane %v379_v44, 1  ;;  %v729_v54 = vld [vmem:[%s1183_s1 + $0x3] ss:$8 sm:$0x3]  ;;  %v430_v60 = vperm.slane %v728_v52, 0 }
  0x1f   : > { %815 = vset.pattern.permute.xlu1 %v923_v9  ;;  %v431_v61 = vperm.slane %v728_v52, 1  ;;  %v454_v62 = vperm.slane %v729_v54, 0  ;;  %v455_v63 = vperm.slane %v729_v54, 1  ;;  %vm480_vm6 = vcmp.lt.s32.totalorder %v1094_v42, 127 }
  0x20   : > { %813 = vset.pattern.permute.xlu2 %v924_v10  ;;  %469 = vperm.xlu1 %815, %v1045_v3   ;;  %v731_v39 = vld [vmem:[%s1183_s1 + $0x5] ss:$8 sm:$0x3]  ;;  %vm504_vm7 = vcmp.lt.s32.totalorder %v1094_v42, 113  ;;  %vm528_vm8 = vcmp.lt.s32.totalorder %v1094_v42, 112  ;;  %vm552_vm9 = vcmp.lt.s32.totalorder %v1094_v42, 111 }
  0x21   : > { %437 = vperm.xlu2 %813, %v1045_v3   ;;  %814 = vset.pattern.permute.xlu0 %v927_v14 }
  0x22   : > { %461 = vperm.xlu0 %814, %v1045_v3  }
  0x23   : > { %v330_v5 = vld.sshfl [vmem:[#allocation1] sm:$0xff pattern:$0x73625140]  ;;  %v331_v6 = vld.sshfl [vmem:[#allocation1 + $0x8] sm:$0xff pattern:$0x73625140] }
  0x24   : > { %v337_v7 = vsel %vm336_vm0, %v330_v5, 0  ;;  %v339_v8 = vsel %vm336_vm0, %v331_v6, 0 }
  0x25   : > { %348 = vmatpush.bf16.msra.mxu0 %v337_v7  ;;  %361 = vmatpush.bf16.msra.mxu1 %v339_v8 }
  0x28   : > { %725 = vmatmul.msk.bf16.vlgmr.msra.gmra.mxu0 %vm332_vm1, %v320_v11  ;;  %726 = vmatmul.msk.bf16.vlgmr.msra.gmra.mxu1 %vm332_vm1, %v320_v11 }
  0x29   : > { %816 = vset.pattern.permute.xlu1 %v925_v12  ;;  %819 = vset.pattern.permute.xlu2 %v934_v25 }
  0x2a   : > { %493 = vperm.xlu1 %816, %v1045_v3   ;;  %820 = vset.pattern.permute.xlu0 %v921_v0 }
  0x32   : > { %817 = vset.pattern.permute.xlu1 %v926_v13 }
  0x33   : > { %517 = vperm.xlu1 %817, %v1045_v3  }
  0x3b   : > { %818 = vset.pattern.permute.xlu1 %v930_v22 }
  0x72   : > { %v414_v28 = vpop.permute.xlu2 %413 }
  0x7b   : > { %v438_v30 = vpop.permute.xlu2 %437 }
  0x89   : > { %v390_v27 = vpop.permute.xlu1 %389 }
  0x8a   : > { %v326_v15 = vpop.permute.xlu0 %325 }
  0x92   : > { %v1088_v29 = vpop.permute.xlu1 %469 }
  0x94   : > { %v462_v34 = vpop.permute.xlu0 %461 }
  0x9c   : > { %v1090_v31 = vpop.permute.xlu1 %493 }
  0xa5   : > { %v350_v16 = vpop.f32.mrf.mxu0  ;;  %v363_v17 = vpop.f32.mrf.mxu1 }
  0xa6   : > { %v351_v18 = vadd.f32 %v350_v16, %v326_v15  ;;  %v364_v19 = vadd.f32 %v363_v17, %v326_v15  ;;  %v1092_v33 = vpop.permute.xlu1 %517  ;;  %v730_v15 = vld [vmem:[%s1183_s1 + $0x4] ss:$8 sm:$0x3] }
  0xa7   : > { %v487_v25 = vperm.slane %v730_v15, 1 }
  0xa8   : > { %v1062_v20 = vmax.f32 %v351_v18, 0.0  ;;  %v1064_v21 = vmax.f32 %v364_v19, 0.0 }
  0xaa   : > { %398 = vrot.lane.b32.xlu2 %v1064_v21, %s928_s18  ;;  %372 = vrot.lane.b32.xlu1 %v1064_v21, %s929_s19 }
  0xab   : > { %370 = vrot.lane.b32.xlu0 %v1062_v20, %s929_s19 }
  0xad   : > { %v352_v23 = vpop.f32.mrf.mxu0  ;;  %v365_v24 = vpop.f32.mrf.mxu1 }
  0xae   : > { %v486_v24 = vperm.slane %v730_v15, 0 }
  0xb2   : > { %420 = vrot.lane.b32.xlu2 %v1062_v20, %s931_s20  ;;  %396 = vrot.lane.b32.xlu1 %v1062_v20, %s928_s18 }
  0xb3   : > { %422 = vrot.lane.b32.xlu0 %v1064_v21, %s931_s20 }
  0xba   : > { %478 = vrot.lane.b32.xlu2 %v1064_v21, %s932_s21  ;;  %446 = vrot.lane.b32.xlu1 %v1064_v21, %s933_s22 }
  0xbb   : > { %444 = vrot.lane.b32.xlu0 %v1062_v20, %s933_s22  ;;  %s311_s22 = sand.u32 1, %s910_s28  }
  0xbc   : > { %s629_s18 = scalar_lea.sflag [#allocation4], %s311_s22 }
  0xc2   : > { %500 = vrot.lane.b32.xlu2 %v1062_v20, %s935_s23  ;;  %476 = vrot.lane.b32.xlu1 %v1062_v20, %s932_s21 }
  0xc3   : > { %502 = vrot.lane.b32.xlu0 %v1064_v21, %s935_s23  ;;  %s742_s23 = sshll.u32 %s1004_s9, 4 }
  0xc4   : > { %s640_s10 = scalar_lea.hbm %s1190_s8, %s742_s23  ;;  %s872_s23 = scalar_lea.hbm %s1190_s8, 32 }
  0xc5   : > { %s644_s17 = sshll.u32 %s640_s10, 4  ;;  %s645_s17 = int_to_ptr.hbm [resolvable:$true] %s644_s17 }
  0xc6   : > { %s866_s9 = sshra.s32 %s645_s17, 4  ;;  %s867_s9 = int_to_ptr.hbm [resolvable:$true] %s866_s9 }
  0xc7   : > { %s868_s19 = scalar_lea.hbm %s867_s9, 16  ;;  %p873_p3 = scmp.lt.s32.totalorder %s867_s9, %s1190_s8 }
  0xc8   : > { %p869_p0 = scmp.ne.s32.totalorder %s867_s9, %s868_s19  ;;  %p874_p4 = scmp.lt.s32.totalorder %s872_s23, %s868_s19 }
  0xca   : > { %524 = vrot.lane.b32.xlu2 %v1062_v20, %s936_s24  ;;  %541 = vperm.xlu1 %818, %v1045_v3   ;;  %p870_p1 = pnand %p869_p0, %p1021_p5  ;;  %p875_p7 = por %p874_p4, %p873_p3 }
  0xcb   : > { %526 = vrot.lane.b32.xlu0 %v1064_v21, %s936_s24  ;;  %s722_s24 = sshll.u32 %s311_s22, 4 }
  0xcc   : > { %s313_s12 = scalar_lea.vmem [#allocation5], %s722_s24  ;;  %p871_p2 = pneg %p870_p1 }
  0xcd   : > { %s642_s13 = sshll.u32 %s313_s12, 4  ;;  %s643_s13 = int_to_ptr.vmem [resolvable:$true] %s642_s13 }
  0xce   : > { %p876_p8 = pnand %p875_p7, %p871_p2 }
  0xd2   : > { %548 = vrot.lane.b32.xlu2 %v1062_v20, %s937_s25  ;;  %821 = vset.pattern.permute.xlu1 %v921_v0 }
  0xd3   : > { %550 = vrot.lane.b32.xlu0 %v1064_v21, %s937_s25 }
  0xda   : > { %565 = vperm.xlu2 %819, %v1045_v3  }
  0xdb   : > { %575 = vperm.xlu0 %820, %v572_v26  }
 0x104   : > { %v399_v32 = vpop.permute.xlu2 %398 }
 0x10c   : > { %v421_v35 = vpop.permute.xlu2 %420 }
 0x114   : > { %v479_v38 = vpop.permute.xlu2 %478 }
 0x11c   : > { %v373_v36 = vpop.permute.xlu1 %372  ;;  %v1103_v45 = vpop.permute.xlu2 %500 }
 0x11d   : > { %v371_v37 = vpop.permute.xlu0 %370 }
 0x11e   : > { %v377_v55 = vsel %vm376_vm3, %v371_v37, %v373_v36  ;;  %v378_v56 = vsel %vm376_vm3, %v373_v36, %v371_v37 }
 0x11f   : > { %v385_v0 = vmul.f32 %v381_v48, %v378_v56  ;;  %v386_v1 = vmul.f32 %v382_v49, %v377_v55 }
 0x121   : > { %v392_v10 = vmul.f32 %v390_v27, %v385_v0  ;;  %v393_v11 = vmul.f32 %v390_v27, %v386_v1 }
 0x124   : > { %v397_v40 = vpop.permute.xlu1 %396  ;;  %v525_v12 = vpop.permute.xlu2 %524 }
 0x125   : > { %v423_v41 = vpop.permute.xlu0 %422  ;;  %v401_v50 = vsel %vm400_vm2, %v397_v40, %v399_v32  ;;  %v402_v51 = vsel %vm400_vm2, %v399_v32, %v397_v40 }
 0x126   : > { %v410_v58 = vmul.f32 %v406_v46, %v402_v51  ;;  %v411_v59 = vmul.f32 %v407_v47, %v401_v50  ;;  %v425_v2 = vsel %vm424_vm4, %v421_v35, %v423_v41  ;;  %v426_v3 = vsel %vm424_vm4, %v423_v41, %v421_v35  ;;  %v585_v35 = vld [vmem:[%s1189_s7] sm:$0xff] }
 0x127   : > { %v434_v8 = vmul.f32 %v430_v60, %v426_v3  ;;  %v435_v9 = vmul.f32 %v431_v61, %v425_v2  ;;  %588 = vperm.xlu1 %821, %v585_v35   ;;  %v510_v46 = vperm.slane %v731_v39, 0  ;;  %v511_v47 = vperm.slane %v731_v39, 1 }
 0x128   : > { %v416_v6 = vmul.f32 %v414_v28, %v410_v58  ;;  %v417_v7 = vmul.f32 %v414_v28, %v411_v59 }
 0x129   : > { %v440_v22 = vmul.f32 %v438_v30, %v434_v8  ;;  %v441_v23 = vmul.f32 %v438_v30, %v435_v9  ;;  %v732_v30 = vld [vmem:[%s1183_s1 + $0x6] ss:$8 sm:$0x3] }
 0x12a   : > { %v418_v18 = vadd.f32 %v416_v6, %v392_v10  ;;  %v419_v19 = vadd.f32 %v417_v7, %v393_v11  ;;  %v534_v48 = vperm.slane %v732_v30, 0  ;;  %v535_v49 = vperm.slane %v732_v30, 1 }
 0x12c   : > { %v447_v53 = vpop.permute.xlu1 %446  ;;  %v442_v36 = vadd.f32 %v440_v22, %v418_v18  ;;  %v443_v37 = vadd.f32 %v441_v23, %v419_v19  ;;  %v549_v51 = vpop.permute.xlu2 %548 }
 0x12d   : > { %v445_v57 = vpop.permute.xlu0 %444 }
 0x12e   : > { %v449_v4 = vsel %vm448_vm5, %v445_v57, %v447_v53  ;;  %v450_v5 = vsel %vm448_vm5, %v447_v53, %v445_v57 }
 0x12f   : > { %v458_v13 = vmul.f32 %v454_v62, %v450_v5  ;;  %v459_v14 = vmul.f32 %v455_v63, %v449_v4 }
 0x131   : > { %v464_v26 = vmul.f32 %v462_v34, %v458_v13  ;;  %v465_v28 = vmul.f32 %v462_v34, %v459_v14  ;;  %v472_v34 = vmul.f32 %v1088_v29, %v1062_v20 }
 0x133   : > { %v466_v43 = vadd.f32 %v464_v26, %v442_v36  ;;  %v467_v44 = vadd.f32 %v465_v28, %v443_v37 }
 0x134   : > { %v477_v16 = vpop.permute.xlu1 %476  ;;  %v566_v8 = vpop.permute.xlu2 %565 }
 0x135   : > { %v503_v17 = vpop.permute.xlu0 %502  ;;  %v481_v27 = vsel %vm480_vm6, %v477_v16, %v479_v38  ;;  %v482_v32 = vsel %vm480_vm6, %v479_v38, %v477_v16  ;;  %v473_v38 = vmul.f32 %v1088_v29, %v1064_v21  ;;  %v474_v57 = vadd.f32 %v472_v34, %v466_v43  ;;  %v733_v29 = vld [vmem:[%s1183_s1 + $0x7] ss:$8 sm:$0x3] }
 0x136   : > { %v490_v40 = vmul.f32 %v486_v24, %v481_v27  ;;  %v491_v41 = vmul.f32 %v487_v25, %v482_v32  ;;  %v505_v52 = vsel %vm504_vm7, %v1103_v45, %v503_v17  ;;  %v506_v53 = vsel %vm504_vm7, %v503_v17, %v1103_v45  ;;  %v582_v27 = vld [vmem:[%s1188_s6] sm:$0xf] }
 0x137   : > { %v475_v21 = vadd.f32 %v473_v38, %v467_v44  ;;  %v514_v58 = vmul.f32 %v510_v46, %v505_v52  ;;  %v515_v59 = vmul.f32 %v511_v47, %v506_v53  ;;  %v558_v0 = vperm.slane %v733_v29, 0 }
 0x138   : > { %v496_v56 = vmul.f32 %v1090_v31, %v490_v40  ;;  %v497_v20 = vmul.f32 %v1090_v31, %v491_v41  ;;  %v559_v1 = vperm.slane %v733_v29, 1 }
 0x139   : > { %v520_v2 = vmul.f32 %v1092_v33, %v514_v58  ;;  %v521_v31 = vmul.f32 %v1092_v33, %v515_v59 }
 0x13a   : > { %v498_v45 = vadd.f32 %v496_v56, %v474_v57  ;;  %v499_v63 = vadd.f32 %v497_v20, %v475_v21 }
 0x13c   : > { %v542_v62 = vpop.permute.xlu1 %541  ;;  %v522_v9 = vadd.f32 %v520_v2, %v498_v45  ;;  %v523_v10 = vadd.f32 %v521_v31, %v499_v63 }
 0x13d   : > { %v527_v50 = vpop.permute.xlu0 %526 }
 0x13e   : > { %v529_v54 = vsel %vm528_vm8, %v525_v12, %v527_v50  ;;  %v530_v55 = vsel %vm528_vm8, %v527_v50, %v525_v12 }
 0x13f   : > { %v538_v60 = vmul.f32 %v534_v48, %v529_v54  ;;  %v539_v61 = vmul.f32 %v535_v49, %v530_v55 }
 0x141   : > { %v544_v3 = vmul.f32 %v542_v62, %v538_v60  ;;  %v545_v4 = vmul.f32 %v542_v62, %v539_v61 }
 0x143   : > { %v546_v13 = vadd.f32 %v544_v3, %v522_v9  ;;  %v547_v42 = vadd.f32 %v545_v4, %v523_v10 }
 0x145   : > { %v551_v5 = vpop.permute.xlu0 %550 }
 0x146   : > { %v553_v6 = vsel %vm552_vm9, %v549_v51, %v551_v5  ;;  %v554_v7 = vsel %vm552_vm9, %v551_v5, %v549_v51 }
 0x147   : > { %v562_v11 = vmul.f32 %v558_v0, %v553_v6  ;;  %v563_v12 = vmul.f32 %v559_v1, %v554_v7 }
 0x149   : > { %v568_v14 = vmul.f32 %v566_v8, %v562_v11  ;;  %v569_v15 = vmul.f32 %v566_v8, %v563_v12 }
 0x14b   : > { %v571_v16 = vadd.f32 %v569_v15, %v547_v42  ;;  %v570_v17 = vadd.f32 %v568_v14, %v546_v13 }
 0x14d   : > { %v576_v18 = vpop.permute.xlu0 %575 }
 0x14e   : > { %v578_v33 = vadd.f32 %v576_v18, %v570_v17  ;;  %v579_v19 = vadd.f32 %v576_v18, %v571_v16 }
 0x150   : > { %v580_v22 = vmax.f32 %v578_v33, 0.0  ;;  %v581_v23 = vmax.f32 %v579_v19, 0.0 }
 0x152   : > { %v583_v24 = vpack.c.bf16 %v580_v22, %v580_v22  ;;  %v584_v25 = vpack.c.bf16 %v581_v23, %v581_v23 }
 0x154   : > { %v595_v26 = vsel %vm336_vm0, %v583_v24, 0  ;;  %v598_v28 = vsel %vm336_vm0, %v584_v25, 0 }
 0x155   : > { %607 = vmatpush.bf16.msra.mxu2 %v595_v26  ;;  %620 = vmatpush.bf16.msra.mxu3 %v598_v28 }
 0x158   : > { %734 = vmatmul.msk.bf16.vlgmr.msra.gmra.mxu2 %vm332_vm1, %v582_v27  ;;  %735 = vmatmul.msk.bf16.vlgmr.msra.gmra.mxu3 %vm332_vm1, %v582_v27 }
 0x199   : > { %v589_v32 = vpop.permute.xlu1 %588 }
 0x1db   : > { %v609_v35 = vpop.f32.mrf.mxu2  ;;  %v622_v36 = vpop.f32.mrf.mxu3 }
 0x1dc   : > { %v610_v37 = vadd.f32 %v609_v35, %v589_v32  ;;  %v623_v39 = vadd.f32 %v622_v36, %v589_v32 }
 0x1de   : > { %626 = vst [vmem:[%s313_s12] sm:$0xff] %v610_v37 }
 0x1df   : > { %627 = vst [vmem:[%s313_s12 + $0x8] sm:$0xff] %v623_v39 }
 0x1e0   : > { %879 = shalt.err (!%p876_p8)
}
 0x1e1   : > { %747 = dma.vmem_to_hbm [thread:$0]  (%p1021_p5), %s643_s13, 256, %s645_s17, %s629_s18  }
 0x1e3   : > { %v611_v30 = vpop.f32.mrf.mxu2  ;;  %v624_v40 = vpop.f32.mrf.mxu3 }
 0x1e4 PF: > { %p759_p9 = scmp.ge.s32.totalorder %s918_s30, 2  ;;  %s656_s22 = sand.u32 1, %s906_s27  }
 0x1e5   : > { %s657_s26 = scalar_lea.sflag [#allocation4], %s656_s22 }
 0x1e6   : > { %p754_p10 = pnand %p759_p9, %p1025_p6 }
 0x1e8   : > { %p755_p11 = pneg %p754_p10 }
 0x1ea   : > { %901 = dma.done.wait (%p755_p11), %s657_s26, 256  }
 0x1eb   : > { %903 = vsyncadd (%p755_p11), %s657_s26, 4294967040  ;;  %p19_p5 = scmp.ge.s32.totalorder %s1008_s11, 4   ;;  %s1193_s27 = smov %s910_s28 }
 0x1ec   : > { %s1194_s28 = smov %s914_s29  ;;  %s1195_s29 = smov %s1019_s14 }
 0x1ed   : > { %s1196_s30 = smov %s1008_s11  ;;  %21 = sbr.rel (!%p19_p5) target bundleno = 4 (0x4), region = 99 }
 0x1f2   :  { %663 = vsyncpa [#allocation3], 1 }
 0x1f3   :  { %665 = vsyncpa [#allocation3 + $0x1], 1 }
 0x1f4   :  { %666 = vsyncpa [#allocation4], 1 }
 0x1f5   :  { %668 = vsyncpa [#allocation4 + $0x1], 1 }

</bundles_post_ra>
